<compile_context>
chip_gen: v6e
topology: v6e:2x2x1
jax: 0.10.0
libtpu: 0.0.40
codegen_flags: <defaults>
</compile_context>

<pallas_src>
import functools

import jax
import jax.numpy as jnp
from jax.experimental import pallas as pl
from jax.experimental.pallas import tpu as pltpu


def _round_up(a, b):
    return (a + b - 1) // b * b


def _sublane_multiple(dtype):
    # Second-to-last VMEM tile dim: 8 for 4-byte, 16 for 2-byte dtypes.
    return max(8, 32 // jnp.dtype(dtype).itemsize)


def _con2_kernel(x_ref, w_ref, b_ref, o_ref, *, kernel_size, stride, w_out):
    """One lane-tile (TN rows) of the (1,K)/(1,S) conv in transposed layout.

    x_ref : (W_used, C, TN)  x_ref[t, ci, n] = x[row n, time t, channel ci]
    w_ref : (K, C, C)        w_ref[k, co, ci] = conv_weight[co, ci, 0, k]
    b_ref : (C, 1)           f32 bias (broadcasts along lanes)
    o_ref : (W_out, C, TN)   o_ref[wo, co, n] = conv output (rows on lanes)
    """
    c = o_ref.shape[1]
    tn = o_ref.shape[2]
    bias = b_ref[...]                       # (C, 1) f32
    for wo in range(w_out):                 # small static trip count (unrolled)
        acc = jnp.zeros((c, tn), jnp.float32)
        for k in range(kernel_size):        # K accumulated MXU matmuls
            acc += jnp.dot(w_ref[k], x_ref[wo * stride + k],
                           preferred_element_type=jnp.float32)
        o_ref[wo] = (acc + bias).astype(o_ref.dtype)


def con2_pallas(x_nchw, weight_oihw, bias, *, time_strides, kernel_size,
                use_bf16=True):
    """Forward pass of `con2` (Conv2d, kernel (1, K), stride (1, S), VALID).

    x_nchw      : (B, C, H, W)
    weight_oihw : (C, C, 1, K)   (PyTorch Conv2d weight layout)
    bias        : (C,)
    returns     : (B, C, H, W_out),  W_out = (W - K) // S + 1
    """
    B, C, H, W = x_nchw.shape
    K, S = kernel_size, time_strides
    W_out = (W - K) // S + 1
    assert W_out >= 1, "input too short for this kernel/stride"
    M = B * H
    W_used = (W_out - 1) * S + K            # only the time steps the conv reads

    out_dtype = x_nchw.dtype
    in_dtype = jnp.bfloat16 if use_bf16 else x_nchw.dtype

    # ---- glue (plain JAX): one layout pass each way ------------------------
    # (B, C, H, W) -> (W_used, C, B*H): rows (the long axis) land on lanes.
    # TODO(synk): if the surrounding model can carry this time/channel-major
    # activation layout, both wrapper transposes (one HBM pass each) go away.
    x_cm = jnp.transpose(x_nchw[:, :, :, :W_used], (3, 1, 0, 2))
    x_cm = x_cm.reshape(W_used, C, M).astype(in_dtype)
    # (O, I, 1, K) -> (K, O, I): one (C, C) tap matrix per k.
    w_packed = jnp.transpose(weight_oihw[:, :, 0, :], (2, 0, 1)).astype(in_dtype)
    b2 = bias.reshape(C, 1).astype(jnp.float32)

    # ---- lane-tile (TN) sizing: (8,128)/(16,128)-padding aware, per-gen ----
    in_item = jnp.dtype(in_dtype).itemsize
    out_item = jnp.dtype(out_dtype).itemsize
    c_in_pad = _round_up(C, _sublane_multiple(in_dtype))
    c_out_pad = _round_up(C, _sublane_multiple(out_dtype))
    per_lane_bytes = (
        2 * W_used * c_in_pad * in_item      # double-buffered input tile
        + 2 * W_out * c_out_pad * out_item   # double-buffered output tile
        + 4 * _round_up(C, 8) * 4            # f32 accumulator / matmul temps
    )
    fixed_bytes = (
        2 * K * c_in_pad * _round_up(C, 128) * in_item   # resident weights
        + 2 * _round_up(C, 8) * 128 * 4                  # bias
        + (2 << 20)                                      # compiler scratch
    )
    try:
        vmem_cap = int(pltpu.get_tpu_info().vmem_capacity_bytes)
    except Exception:
        vmem_cap = 64 << 20                  # conservative: v7x per-core VMEM
    budget = int(vmem_cap * 0.7)

    M_lanes = _round_up(M, 128)
    tn_budget = max(128, (budget - fixed_bytes) // per_lane_bytes // 128 * 128)
    TN = min(tn_budget, M_lanes, 4096)
    # v7x has 2 TensorCores: ensure the "parallel" grid has >= 2 steps when
    # there is enough real work to split.
    if TN >= M_lanes and M_lanes >= 256:
        TN = max(128, (M_lanes // 2) // 128 * 128)
    M_pad = _round_up(M, TN)
    if M_pad != M:
        x_cm = jnp.pad(x_cm, ((0, 0), (0, 0), (0, M_pad - M)))

    footprint = fixed_bytes + per_lane_bytes * TN
    vmem_limit = min(int(vmem_cap * 0.85), 100 << 20)   # ~96-100 MiB on v5e/v6e
    vmem_limit = max(vmem_limit, footprint + (2 << 20))
    vmem_limit = min(vmem_limit, int(vmem_cap * 0.95))

    kernel = functools.partial(
        _con2_kernel, kernel_size=K, stride=S, w_out=W_out)

    out_t = pl.pallas_call(
        kernel,
        out_shape=jax.ShapeDtypeStruct((W_out, C, M_pad), out_dtype),
        grid=(M_pad // TN,),
        in_specs=[
            # TODO(synk): add pipeline_mode=pl.Buffered(3) here only if
            # profiling shows exposed DMA after TN is maxed out (the VMEM
            # accounting above already leaves the required headroom).
            pl.BlockSpec((W_used, C, TN), lambda i: (0, 0, i)),
            pl.BlockSpec((K, C, C), lambda i: (0, 0, 0)),      # resident weights
            pl.BlockSpec((C, 1), lambda i: (0, 0)),            # resident bias
        ],
        out_specs=pl.BlockSpec((W_out, C, TN), lambda i: (0, 0, i)),
        compiler_params=pltpu.CompilerParams(
            dimension_semantics=("parallel",),
            vmem_limit_bytes=vmem_limit,
        ),
    )(x_cm, w_packed, b2)

    out = out_t[:, :, :M].reshape(W_out, C, B, H)
    return jnp.transpose(out, (2, 1, 3, 0))   # -> (B, C, H, W_out)


def con2_reference(x_nchw, weight_oihw, bias, *, time_strides):
    """Pure-JAX reference matching PyTorch nn.Conv2d semantics."""
    out = jax.lax.conv_general_dilated(
        x_nchw,
        weight_oihw,
        window_strides=(1, time_strides),
        padding="VALID",
        dimension_numbers=("NCHW", "OIHW", "NCHW"),
    )
    return out + bias.reshape(1, -1, 1, 1)


def _run_case(key, B, C, H, W, kernel_size, time_strides, use_bf16):
    kx, kw, kb = jax.random.split(key, 3)
    x = jax.random.normal(kx, (B, C, H, W), dtype=jnp.float32)
    fan_in = C * 1 * kernel_size
    bound = 1.0 / (fan_in ** 0.5)
    weight = jax.random.uniform(
        kw, (C, C, 1, kernel_size), dtype=jnp.float32, minval=-bound, maxval=bound
    )
    bias = jax.random.uniform(
        kb, (C,), dtype=jnp.float32, minval=-bound, maxval=bound
    )

    out = con2_pallas(x, weight, bias, time_strides=time_strides,
                      kernel_size=kernel_size, use_bf16=use_bf16)
    out = jax.block_until_ready(out)

    ref = con2_reference(x, weight, bias, time_strides=time_strides)
    assert out.shape == ref.shape, (out.shape, ref.shape)
    if use_bf16:
        # bf16 MXU operands (f32 accumulation): tight check against a
        # reference on bf16-rounded operands, loose check against true f32.
        ref_q = con2_reference(
            x.astype(jnp.bfloat16).astype(jnp.float32),
            weight.astype(jnp.bfloat16).astype(jnp.float32),
            bias, time_strides=time_strides)
        err_q = float(jnp.max(jnp.abs(out - ref_q)))
        assert jnp.allclose(out, ref_q, atol=1e-3, rtol=1e-3), err_q
        err = float(jnp.max(jnp.abs(out - ref)))
        assert jnp.allclose(out, ref, atol=3e-2, rtol=3e-2), err
    else:
        err = float(jnp.max(jnp.abs(out - ref)))
        assert jnp.allclose(out, ref, atol=1e-4, rtol=1e-4), err


if __name__ == "__main__":
    key = jax.random.PRNGKey(0)
    k1, k2, k3 = jax.random.split(key, 3)
    # Primary config consistent with the module (kernel 3, stride 2), bf16 MXU path.
    _run_case(k1, B=2, C=4, H=3, W=16, kernel_size=3, time_strides=2, use_bf16=True)
    # Same config on the f32 path (tight numerical check of the layout logic).
    _run_case(k2, B=2, C=4, H=3, W=16, kernel_size=3, time_strides=2, use_bf16=False)
    # Stride 1, different channel count.
    _run_case(k3, B=2, C=8, H=5, W=20, kernel_size=2, time_strides=1, use_bf16=True)
    print("KERNEL_OK")
</pallas_src>

<mosaic_0001>
module attributes {stable_mosaic.version = 11 : i64} {
  func.func @_con2_kernel(%arg0: i32, %arg1: memref<15x4x128xbf16, #tpu.memory_space<vmem>>, %arg2: memref<3x4x4xbf16, #tpu.memory_space<vmem>>, %arg3: memref<4x1xf32, #tpu.memory_space<vmem>>, %arg4: memref<7x4x128xf32, #tpu.memory_space<vmem>>) attributes {dimension_semantics = [#tpu.dimension_semantics<parallel>], iteration_bounds = array<i64: 1>, scalar_prefetch = 0 : i64, scratch_operands = 0 : i64, tpu.core_type = #tpu.core_type<tc>, window_params = [{transform_indices = @transform_0, window_bounds = array<i64: 15, 4, 128>}, {pipeline_mode = #tpu.pipeline_mode<synchronous>, transform_indices = @transform_1, window_bounds = array<i64: 3, 4, 4>}, {pipeline_mode = #tpu.pipeline_mode<synchronous>, transform_indices = @transform_2, window_bounds = array<i64: 4, 1>}, {transform_indices = @transform_3, window_bounds = array<i64: 7, 4, 128>}]} {
    %c0 = arith.constant 0 : index
    %c0_0 = arith.constant 0 : index
    %0 = vector.load %arg3[%c0, %c0_0] : memref<4x1xf32, #tpu.memory_space<vmem>>, vector<4x1xf32>
    %cst = arith.constant 0.000000e+00 : f32
    %1 = vector.broadcast %cst : f32 to vector<4x128xf32>
    %c0_1 = arith.constant 0 : index
    %c0_2 = arith.constant 0 : index
    %c0_3 = arith.constant 0 : index
    %2 = vector.load %arg2[%c0_1, %c0_2, %c0_3] : memref<3x4x4xbf16, #tpu.memory_space<vmem>>, vector<1x4x4xbf16>
    %3 = vector.shape_cast %2 : vector<1x4x4xbf16> to vector<4x4xbf16>
    %c0_4 = arith.constant 0 : index
    %c0_5 = arith.constant 0 : index
    %c0_6 = arith.constant 0 : index
    %4 = vector.load %arg1[%c0_4, %c0_5, %c0_6] : memref<15x4x128xbf16, #tpu.memory_space<vmem>>, vector<1x4x128xbf16>
    %5 = vector.shape_cast %4 : vector<1x4x128xbf16> to vector<4x128xbf16>
    %cst_7 = arith.constant dense<0.000000e+00> : vector<4x128xf32>
    %6 = tpu.matmul %3, %5, %cst_7 {dimension_numbers = #tpu.dot_dimension_numbers<[1], [0], [0], [1], [0, 0, 1, 1], [], []>} : vector<4x4xbf16>, vector<4x128xbf16>, vector<4x128xf32> -> vector<4x128xf32>
    %7 = arith.addf %1, %6 : vector<4x128xf32>
    %c1 = arith.constant 1 : index
    %c0_8 = arith.constant 0 : index
    %c0_9 = arith.constant 0 : index
    %8 = vector.load %arg2[%c1, %c0_8, %c0_9] : memref<3x4x4xbf16, #tpu.memory_space<vmem>>, vector<1x4x4xbf16>
    %9 = vector.shape_cast %8 : vector<1x4x4xbf16> to vector<4x4xbf16>
    %c1_10 = arith.constant 1 : index
    %c0_11 = arith.constant 0 : index
    %c0_12 = arith.constant 0 : index
    %10 = vector.load %arg1[%c1_10, %c0_11, %c0_12] : memref<15x4x128xbf16, #tpu.memory_space<vmem>>, vector<1x4x128xbf16>
    %11 = vector.shape_cast %10 : vector<1x4x128xbf16> to vector<4x128xbf16>
    %cst_13 = arith.constant dense<0.000000e+00> : vector<4x128xf32>
    %12 = tpu.matmul %9, %11, %cst_13 {dimension_numbers = #tpu.dot_dimension_numbers<[1], [0], [0], [1], [0, 0, 1, 1], [], []>} : vector<4x4xbf16>, vector<4x128xbf16>, vector<4x128xf32> -> vector<4x128xf32>
    %13 = arith.addf %7, %12 : vector<4x128xf32>
    %c2 = arith.constant 2 : index
    %c0_14 = arith.constant 0 : index
    %c0_15 = arith.constant 0 : index
    %14 = vector.load %arg2[%c2, %c0_14, %c0_15] : memref<3x4x4xbf16, #tpu.memory_space<vmem>>, vector<1x4x4xbf16>
    %15 = vector.shape_cast %14 : vector<1x4x4xbf16> to vector<4x4xbf16>
    %c2_16 = arith.constant 2 : index
    %c0_17 = arith.constant 0 : index
    %c0_18 = arith.constant 0 : index
    %16 = vector.load %arg1[%c2_16, %c0_17, %c0_18] : memref<15x4x128xbf16, #tpu.memory_space<vmem>>, vector<1x4x128xbf16>
    %17 = vector.shape_cast %16 : vector<1x4x128xbf16> to vector<4x128xbf16>
    %cst_19 = arith.constant dense<0.000000e+00> : vector<4x128xf32>
    %18 = tpu.matmul %15, %17, %cst_19 {dimension_numbers = #tpu.dot_dimension_numbers<[1], [0], [0], [1], [0, 0, 1, 1], [], []>} : vector<4x4xbf16>, vector<4x128xbf16>, vector<4x128xf32> -> vector<4x128xf32>
    %19 = arith.addf %13, %18 : vector<4x128xf32>
    %20 = vector.broadcast %0 : vector<4x1xf32> to vector<4x128xf32>
    %21 = arith.addf %19, %20 : vector<4x128xf32>
    %c0_20 = arith.constant 0 : index
    %c0_21 = arith.constant 0 : index
    %c0_22 = arith.constant 0 : index
    %22 = vector.load %arg4[%c0_20, %c0_21, %c0_22] : memref<7x4x128xf32, #tpu.memory_space<vmem>>, vector<1x4x128xf32>
    %23 = vector.shape_cast %22 : vector<1x4x128xf32> to vector<4x128xf32>
    %24 = vector.shape_cast %21 : vector<4x128xf32> to vector<1x4x128xf32>
    tpu.vector_store %arg4[%c0_20, %c0_21, %c0_22], %24 {strides = array<i32>} : memref<7x4x128xf32, #tpu.memory_space<vmem>>, vector<1x4x128xf32>,
    %cst_23 = arith.constant 0.000000e+00 : f32
    %25 = vector.broadcast %cst_23 : f32 to vector<4x128xf32>
    %c0_24 = arith.constant 0 : index
    %c0_25 = arith.constant 0 : index
    %c0_26 = arith.constant 0 : index
    %26 = vector.load %arg2[%c0_24, %c0_25, %c0_26] : memref<3x4x4xbf16, #tpu.memory_space<vmem>>, vector<1x4x4xbf16>
    %27 = vector.shape_cast %26 : vector<1x4x4xbf16> to vector<4x4xbf16>
    %c2_27 = arith.constant 2 : index
    %c0_28 = arith.constant 0 : index
    %c0_29 = arith.constant 0 : index
    %28 = vector.load %arg1[%c2_27, %c0_28, %c0_29] : memref<15x4x128xbf16, #tpu.memory_space<vmem>>, vector<1x4x128xbf16>
    %29 = vector.shape_cast %28 : vector<1x4x128xbf16> to vector<4x128xbf16>
    %cst_30 = arith.constant dense<0.000000e+00> : vector<4x128xf32>
    %30 = tpu.matmul %27, %29, %cst_30 {dimension_numbers = #tpu.dot_dimension_numbers<[1], [0], [0], [1], [0, 0, 1, 1], [], []>} : vector<4x4xbf16>, vector<4x128xbf16>, vector<4x128xf32> -> vector<4x128xf32>
    %31 = arith.addf %25, %30 : vector<4x128xf32>
    %c1_31 = arith.constant 1 : index
    %c0_32 = arith.constant 0 : index
    %c0_33 = arith.constant 0 : index
    %32 = vector.load %arg2[%c1_31, %c0_32, %c0_33] : memref<3x4x4xbf16, #tpu.memory_space<vmem>>, vector<1x4x4xbf16>
    %33 = vector.shape_cast %32 : vector<1x4x4xbf16> to vector<4x4xbf16>
    %c3 = arith.constant 3 : index
    %c0_34 = arith.constant 0 : index
    %c0_35 = arith.constant 0 : index
    %34 = vector.load %arg1[%c3, %c0_34, %c0_35] : memref<15x4x128xbf16, #tpu.memory_space<vmem>>, vector<1x4x128xbf16>
    %35 = vector.shape_cast %34 : vector<1x4x128xbf16> to vector<4x128xbf16>
    %cst_36 = arith.constant dense<0.000000e+00> : vector<4x128xf32>
    %36 = tpu.matmul %33, %35, %cst_36 {dimension_numbers = #tpu.dot_dimension_numbers<[1], [0], [0], [1], [0, 0, 1, 1], [], []>} : vector<4x4xbf16>, vector<4x128xbf16>, vector<4x128xf32> -> vector<4x128xf32>
    %37 = arith.addf %31, %36 : vector<4x128xf32>
    %c2_37 = arith.constant 2 : index
    %c0_38 = arith.constant 0 : index
    %c0_39 = arith.constant 0 : index
    %38 = vector.load %arg2[%c2_37, %c0_38, %c0_39] : memref<3x4x4xbf16, #tpu.memory_space<vmem>>, vector<1x4x4xbf16>
    %39 = vector.shape_cast %38 : vector<1x4x4xbf16> to vector<4x4xbf16>
    %c4 = arith.constant 4 : index
    %c0_40 = arith.constant 0 : index
    %c0_41 = arith.constant 0 : index
    %40 = vector.load %arg1[%c4, %c0_40, %c0_41] : memref<15x4x128xbf16, #tpu.memory_space<vmem>>, vector<1x4x128xbf16>
    %41 = vector.shape_cast %40 : vector<1x4x128xbf16> to vector<4x128xbf16>
    %cst_42 = arith.constant dense<0.000000e+00> : vector<4x128xf32>
    %42 = tpu.matmul %39, %41, %cst_42 {dimension_numbers = #tpu.dot_dimension_numbers<[1], [0], [0], [1], [0, 0, 1, 1], [], []>} : vector<4x4xbf16>, vector<4x128xbf16>, vector<4x128xf32> -> vector<4x128xf32>
    %43 = arith.addf %37, %42 : vector<4x128xf32>
    %44 = vector.broadcast %0 : vector<4x1xf32> to vector<4x128xf32>
    %45 = arith.addf %43, %44 : vector<4x128xf32>
    %c1_43 = arith.constant 1 : index
    %c0_44 = arith.constant 0 : index
    %c0_45 = arith.constant 0 : index
    %46 = vector.load %arg4[%c1_43, %c0_44, %c0_45] : memref<7x4x128xf32, #tpu.memory_space<vmem>>, vector<1x4x128xf32>
    %47 = vector.shape_cast %46 : vector<1x4x128xf32> to vector<4x128xf32>
    %48 = vector.shape_cast %45 : vector<4x128xf32> to vector<1x4x128xf32>
    tpu.vector_store %arg4[%c1_43, %c0_44, %c0_45], %48 {strides = array<i32>} : memref<7x4x128xf32, #tpu.memory_space<vmem>>, vector<1x4x128xf32>,
    %cst_46 = arith.constant 0.000000e+00 : f32
    %49 = vector.broadcast %cst_46 : f32 to vector<4x128xf32>
    %c0_47 = arith.constant 0 : index
    %c0_48 = arith.constant 0 : index
    %c0_49 = arith.constant 0 : index
    %50 = vector.load %arg2[%c0_47, %c0_48, %c0_49] : memref<3x4x4xbf16, #tpu.memory_space<vmem>>, vector<1x4x4xbf16>
    %51 = vector.shape_cast %50 : vector<1x4x4xbf16> to vector<4x4xbf16>
    %c4_50 = arith.constant 4 : index
    %c0_51 = arith.constant 0 : index
    %c0_52 = arith.constant 0 : index
    %52 = vector.load %arg1[%c4_50, %c0_51, %c0_52] : memref<15x4x128xbf16, #tpu.memory_space<vmem>>, vector<1x4x128xbf16>
    %53 = vector.shape_cast %52 : vector<1x4x128xbf16> to vector<4x128xbf16>
    %cst_53 = arith.constant dense<0.000000e+00> : vector<4x128xf32>
    %54 = tpu.matmul %51, %53, %cst_53 {dimension_numbers = #tpu.dot_dimension_numbers<[1], [0], [0], [1], [0, 0, 1, 1], [], []>} : vector<4x4xbf16>, vector<4x128xbf16>, vector<4x128xf32> -> vector<4x128xf32>
    %55 = arith.addf %49, %54 : vector<4x128xf32>
    %c1_54 = arith.constant 1 : index
    %c0_55 = arith.constant 0 : index
    %c0_56 = arith.constant 0 : index
    %56 = vector.load %arg2[%c1_54, %c0_55, %c0_56] : memref<3x4x4xbf16, #tpu.memory_space<vmem>>, vector<1x4x4xbf16>
    %57 = vector.shape_cast %56 : vector<1x4x4xbf16> to vector<4x4xbf16>
    %c5 = arith.constant 5 : index
    %c0_57 = arith.constant 0 : index
    %c0_58 = arith.constant 0 : index
    %58 = vector.load %arg1[%c5, %c0_57, %c0_58] : memref<15x4x128xbf16, #tpu.memory_space<vmem>>, vector<1x4x128xbf16>
    %59 = vector.shape_cast %58 : vector<1x4x128xbf16> to vector<4x128xbf16>
    %cst_59 = arith.constant dense<0.000000e+00> : vector<4x128xf32>
    %60 = tpu.matmul %57, %59, %cst_59 {dimension_numbers = #tpu.dot_dimension_numbers<[1], [0], [0], [1], [0, 0, 1, 1], [], []>} : vector<4x4xbf16>, vector<4x128xbf16>, vector<4x128xf32> -> vector<4x128xf32>
    %61 = arith.addf %55, %60 : vector<4x128xf32>
    %c2_60 = arith.constant 2 : index
    %c0_61 = arith.constant 0 : index
    %c0_62 = arith.constant 0 : index
    %62 = vector.load %arg2[%c2_60, %c0_61, %c0_62] : memref<3x4x4xbf16, #tpu.memory_space<vmem>>, vector<1x4x4xbf16>
    %63 = vector.shape_cast %62 : vector<1x4x4xbf16> to vector<4x4xbf16>
    %c6 = arith.constant 6 : index
    %c0_63 = arith.constant 0 : index
    %c0_64 = arith.constant 0 : index
    %64 = vector.load %arg1[%c6, %c0_63, %c0_64] : memref<15x4x128xbf16, #tpu.memory_space<vmem>>, vector<1x4x128xbf16>
    %65 = vector.shape_cast %64 : vector<1x4x128xbf16> to vector<4x128xbf16>
    %cst_65 = arith.constant dense<0.000000e+00> : vector<4x128xf32>
    %66 = tpu.matmul %63, %65, %cst_65 {dimension_numbers = #tpu.dot_dimension_numbers<[1], [0], [0], [1], [0, 0, 1, 1], [], []>} : vector<4x4xbf16>, vector<4x128xbf16>, vector<4x128xf32> -> vector<4x128xf32>
    %67 = arith.addf %61, %66 : vector<4x128xf32>
    %68 = vector.broadcast %0 : vector<4x1xf32> to vector<4x128xf32>
    %69 = arith.addf %67, %68 : vector<4x128xf32>
    %c2_66 = arith.constant 2 : index
    %c0_67 = arith.constant 0 : index
    %c0_68 = arith.constant 0 : index
    %70 = vector.load %arg4[%c2_66, %c0_67, %c0_68] : memref<7x4x128xf32, #tpu.memory_space<vmem>>, vector<1x4x128xf32>
    %71 = vector.shape_cast %70 : vector<1x4x128xf32> to vector<4x128xf32>
    %72 = vector.shape_cast %69 : vector<4x128xf32> to vector<1x4x128xf32>
    tpu.vector_store %arg4[%c2_66, %c0_67, %c0_68], %72 {strides = array<i32>} : memref<7x4x128xf32, #tpu.memory_space<vmem>>, vector<1x4x128xf32>,
    %cst_69 = arith.constant 0.000000e+00 : f32
    %73 = vector.broadcast %cst_69 : f32 to vector<4x128xf32>
    %c0_70 = arith.constant 0 : index
    %c0_71 = arith.constant 0 : index
    %c0_72 = arith.constant 0 : index
    %74 = vector.load %arg2[%c0_70, %c0_71, %c0_72] : memref<3x4x4xbf16, #tpu.memory_space<vmem>>, vector<1x4x4xbf16>
    %75 = vector.shape_cast %74 : vector<1x4x4xbf16> to vector<4x4xbf16>
    %c6_73 = arith.constant 6 : index
    %c0_74 = arith.constant 0 : index
    %c0_75 = arith.constant 0 : index
    %76 = vector.load %arg1[%c6_73, %c0_74, %c0_75] : memref<15x4x128xbf16, #tpu.memory_space<vmem>>, vector<1x4x128xbf16>
    %77 = vector.shape_cast %76 : vector<1x4x128xbf16> to vector<4x128xbf16>
    %cst_76 = arith.constant dense<0.000000e+00> : vector<4x128xf32>
    %78 = tpu.matmul %75, %77, %cst_76 {dimension_numbers = #tpu.dot_dimension_numbers<[1], [0], [0], [1], [0, 0, 1, 1], [], []>} : vector<4x4xbf16>, vector<4x128xbf16>, vector<4x128xf32> -> vector<4x128xf32>
    %79 = arith.addf %73, %78 : vector<4x128xf32>
    %c1_77 = arith.constant 1 : index
    %c0_78 = arith.constant 0 : index
    %c0_79 = arith.constant 0 : index
    %80 = vector.load %arg2[%c1_77, %c0_78, %c0_79] : memref<3x4x4xbf16, #tpu.memory_space<vmem>>, vector<1x4x4xbf16>
    %81 = vector.shape_cast %80 : vector<1x4x4xbf16> to vector<4x4xbf16>
    %c7 = arith.constant 7 : index
    %c0_80 = arith.constant 0 : index
    %c0_81 = arith.constant 0 : index
    %82 = vector.load %arg1[%c7, %c0_80, %c0_81] : memref<15x4x128xbf16, #tpu.memory_space<vmem>>, vector<1x4x128xbf16>
    %83 = vector.shape_cast %82 : vector<1x4x128xbf16> to vector<4x128xbf16>
    %cst_82 = arith.constant dense<0.000000e+00> : vector<4x128xf32>
    %84 = tpu.matmul %81, %83, %cst_82 {dimension_numbers = #tpu.dot_dimension_numbers<[1], [0], [0], [1], [0, 0, 1, 1], [], []>} : vector<4x4xbf16>, vector<4x128xbf16>, vector<4x128xf32> -> vector<4x128xf32>
    %85 = arith.addf %79, %84 : vector<4x128xf32>
    %c2_83 = arith.constant 2 : index
    %c0_84 = arith.constant 0 : index
    %c0_85 = arith.constant 0 : index
    %86 = vector.load %arg2[%c2_83, %c0_84, %c0_85] : memref<3x4x4xbf16, #tpu.memory_space<vmem>>, vector<1x4x4xbf16>
    %87 = vector.shape_cast %86 : vector<1x4x4xbf16> to vector<4x4xbf16>
    %c8 = arith.constant 8 : index
    %c0_86 = arith.constant 0 : index
    %c0_87 = arith.constant 0 : index
    %88 = vector.load %arg1[%c8, %c0_86, %c0_87] : memref<15x4x128xbf16, #tpu.memory_space<vmem>>, vector<1x4x128xbf16>
    %89 = vector.shape_cast %88 : vector<1x4x128xbf16> to vector<4x128xbf16>
    %cst_88 = arith.constant dense<0.000000e+00> : vector<4x128xf32>
    %90 = tpu.matmul %87, %89, %cst_88 {dimension_numbers = #tpu.dot_dimension_numbers<[1], [0], [0], [1], [0, 0, 1, 1], [], []>} : vector<4x4xbf16>, vector<4x128xbf16>, vector<4x128xf32> -> vector<4x128xf32>
    %91 = arith.addf %85, %90 : vector<4x128xf32>
    %92 = vector.broadcast %0 : vector<4x1xf32> to vector<4x128xf32>
    %93 = arith.addf %91, %92 : vector<4x128xf32>
    %c3_89 = arith.constant 3 : index
    %c0_90 = arith.constant 0 : index
    %c0_91 = arith.constant 0 : index
    %94 = vector.load %arg4[%c3_89, %c0_90, %c0_91] : memref<7x4x128xf32, #tpu.memory_space<vmem>>, vector<1x4x128xf32>
    %95 = vector.shape_cast %94 : vector<1x4x128xf32> to vector<4x128xf32>
    %96 = vector.shape_cast %93 : vector<4x128xf32> to vector<1x4x128xf32>
    tpu.vector_store %arg4[%c3_89, %c0_90, %c0_91], %96 {strides = array<i32>} : memref<7x4x128xf32, #tpu.memory_space<vmem>>, vector<1x4x128xf32>,
    %cst_92 = arith.constant 0.000000e+00 : f32
    %97 = vector.broadcast %cst_92 : f32 to vector<4x128xf32>
    %c0_93 = arith.constant 0 : index
    %c0_94 = arith.constant 0 : index
    %c0_95 = arith.constant 0 : index
    %98 = vector.load %arg2[%c0_93, %c0_94, %c0_95] : memref<3x4x4xbf16, #tpu.memory_space<vmem>>, vector<1x4x4xbf16>
    %99 = vector.shape_cast %98 : vector<1x4x4xbf16> to vector<4x4xbf16>
    %c8_96 = arith.constant 8 : index
    %c0_97 = arith.constant 0 : index
    %c0_98 = arith.constant 0 : index
    %100 = vector.load %arg1[%c8_96, %c0_97, %c0_98] : memref<15x4x128xbf16, #tpu.memory_space<vmem>>, vector<1x4x128xbf16>
    %101 = vector.shape_cast %100 : vector<1x4x128xbf16> to vector<4x128xbf16>
    %cst_99 = arith.constant dense<0.000000e+00> : vector<4x128xf32>
    %102 = tpu.matmul %99, %101, %cst_99 {dimension_numbers = #tpu.dot_dimension_numbers<[1], [0], [0], [1], [0, 0, 1, 1], [], []>} : vector<4x4xbf16>, vector<4x128xbf16>, vector<4x128xf32> -> vector<4x128xf32>
    %103 = arith.addf %97, %102 : vector<4x128xf32>
    %c1_100 = arith.constant 1 : index
    %c0_101 = arith.constant 0 : index
    %c0_102 = arith.constant 0 : index
    %104 = vector.load %arg2[%c1_100, %c0_101, %c0_102] : memref<3x4x4xbf16, #tpu.memory_space<vmem>>, vector<1x4x4xbf16>
    %105 = vector.shape_cast %104 : vector<1x4x4xbf16> to vector<4x4xbf16>
    %c9 = arith.constant 9 : index
    %c0_103 = arith.constant 0 : index
    %c0_104 = arith.constant 0 : index
    %106 = vector.load %arg1[%c9, %c0_103, %c0_104] : memref<15x4x128xbf16, #tpu.memory_space<vmem>>, vector<1x4x128xbf16>
    %107 = vector.shape_cast %106 : vector<1x4x128xbf16> to vector<4x128xbf16>
    %cst_105 = arith.constant dense<0.000000e+00> : vector<4x128xf32>
    %108 = tpu.matmul %105, %107, %cst_105 {dimension_numbers = #tpu.dot_dimension_numbers<[1], [0], [0], [1], [0, 0, 1, 1], [], []>} : vector<4x4xbf16>, vector<4x128xbf16>, vector<4x128xf32> -> vector<4x128xf32>
    %109 = arith.addf %103, %108 : vector<4x128xf32>
    %c2_106 = arith.constant 2 : index
    %c0_107 = arith.constant 0 : index
    %c0_108 = arith.constant 0 : index
    %110 = vector.load %arg2[%c2_106, %c0_107, %c0_108] : memref<3x4x4xbf16, #tpu.memory_space<vmem>>, vector<1x4x4xbf16>
    %111 = vector.shape_cast %110 : vector<1x4x4xbf16> to vector<4x4xbf16>
    %c10 = arith.constant 10 : index
    %c0_109 = arith.constant 0 : index
    %c0_110 = arith.constant 0 : index
    %112 = vector.load %arg1[%c10, %c0_109, %c0_110] : memref<15x4x128xbf16, #tpu.memory_space<vmem>>, vector<1x4x128xbf16>
    %113 = vector.shape_cast %112 : vector<1x4x128xbf16> to vector<4x128xbf16>
    %cst_111 = arith.constant dense<0.000000e+00> : vector<4x128xf32>
    %114 = tpu.matmul %111, %113, %cst_111 {dimension_numbers = #tpu.dot_dimension_numbers<[1], [0], [0], [1], [0, 0, 1, 1], [], []>} : vector<4x4xbf16>, vector<4x128xbf16>, vector<4x128xf32> -> vector<4x128xf32>
    %115 = arith.addf %109, %114 : vector<4x128xf32>
    %116 = vector.broadcast %0 : vector<4x1xf32> to vector<4x128xf32>
    %117 = arith.addf %115, %116 : vector<4x128xf32>
    %c4_112 = arith.constant 4 : index
    %c0_113 = arith.constant 0 : index
    %c0_114 = arith.constant 0 : index
    %118 = vector.load %arg4[%c4_112, %c0_113, %c0_114] : memref<7x4x128xf32, #tpu.memory_space<vmem>>, vector<1x4x128xf32>
    %119 = vector.shape_cast %118 : vector<1x4x128xf32> to vector<4x128xf32>
    %120 = vector.shape_cast %117 : vector<4x128xf32> to vector<1x4x128xf32>
    tpu.vector_store %arg4[%c4_112, %c0_113, %c0_114], %120 {strides = array<i32>} : memref<7x4x128xf32, #tpu.memory_space<vmem>>, vector<1x4x128xf32>,
    %cst_115 = arith.constant 0.000000e+00 : f32
    %121 = vector.broadcast %cst_115 : f32 to vector<4x128xf32>
    %c0_116 = arith.constant 0 : index
    %c0_117 = arith.constant 0 : index
    %c0_118 = arith.constant 0 : index
    %122 = vector.load %arg2[%c0_116, %c0_117, %c0_118] : memref<3x4x4xbf16, #tpu.memory_space<vmem>>, vector<1x4x4xbf16>
    %123 = vector.shape_cast %122 : vector<1x4x4xbf16> to vector<4x4xbf16>
    %c10_119 = arith.constant 10 : index
    %c0_120 = arith.constant 0 : index
    %c0_121 = arith.constant 0 : index
    %124 = vector.load %arg1[%c10_119, %c0_120, %c0_121] : memref<15x4x128xbf16, #tpu.memory_space<vmem>>, vector<1x4x128xbf16>
    %125 = vector.shape_cast %124 : vector<1x4x128xbf16> to vector<4x128xbf16>
    %cst_122 = arith.constant dense<0.000000e+00> : vector<4x128xf32>
    %126 = tpu.matmul %123, %125, %cst_122 {dimension_numbers = #tpu.dot_dimension_numbers<[1], [0], [0], [1], [0, 0, 1, 1], [], []>} : vector<4x4xbf16>, vector<4x128xbf16>, vector<4x128xf32> -> vector<4x128xf32>
    %127 = arith.addf %121, %126 : vector<4x128xf32>
    %c1_123 = arith.constant 1 : index
    %c0_124 = arith.constant 0 : index
    %c0_125 = arith.constant 0 : index
    %128 = vector.load %arg2[%c1_123, %c0_124, %c0_125] : memref<3x4x4xbf16, #tpu.memory_space<vmem>>, vector<1x4x4xbf16>
    %129 = vector.shape_cast %128 : vector<1x4x4xbf16> to vector<4x4xbf16>
    %c11 = arith.constant 11 : index
    %c0_126 = arith.constant 0 : index
    %c0_127 = arith.constant 0 : index
    %130 = vector.load %arg1[%c11, %c0_126, %c0_127] : memref<15x4x128xbf16, #tpu.memory_space<vmem>>, vector<1x4x128xbf16>
    %131 = vector.shape_cast %130 : vector<1x4x128xbf16> to vector<4x128xbf16>
    %cst_128 = arith.constant dense<0.000000e+00> : vector<4x128xf32>
    %132 = tpu.matmul %129, %131, %cst_128 {dimension_numbers = #tpu.dot_dimension_numbers<[1], [0], [0], [1], [0, 0, 1, 1], [], []>} : vector<4x4xbf16>, vector<4x128xbf16>, vector<4x128xf32> -> vector<4x128xf32>
    %133 = arith.addf %127, %132 : vector<4x128xf32>
    %c2_129 = arith.constant 2 : index
    %c0_130 = arith.constant 0 : index
    %c0_131 = arith.constant 0 : index
    %134 = vector.load %arg2[%c2_129, %c0_130, %c0_131] : memref<3x4x4xbf16, #tpu.memory_space<vmem>>, vector<1x4x4xbf16>
    %135 = vector.shape_cast %134 : vector<1x4x4xbf16> to vector<4x4xbf16>
    %c12 = arith.constant 12 : index
    %c0_132 = arith.constant 0 : index
    %c0_133 = arith.constant 0 : index
    %136 = vector.load %arg1[%c12, %c0_132, %c0_133] : memref<15x4x128xbf16, #tpu.memory_space<vmem>>, vector<1x4x128xbf16>
    %137 = vector.shape_cast %136 : vector<1x4x128xbf16> to vector<4x128xbf16>
    %cst_134 = arith.constant dense<0.000000e+00> : vector<4x128xf32>
    %138 = tpu.matmul %135, %137, %cst_134 {dimension_numbers = #tpu.dot_dimension_numbers<[1], [0], [0], [1], [0, 0, 1, 1], [], []>} : vector<4x4xbf16>, vector<4x128xbf16>, vector<4x128xf32> -> vector<4x128xf32>
    %139 = arith.addf %133, %138 : vector<4x128xf32>
    %140 = vector.broadcast %0 : vector<4x1xf32> to vector<4x128xf32>
    %141 = arith.addf %139, %140 : vector<4x128xf32>
    %c5_135 = arith.constant 5 : index
    %c0_136 = arith.constant 0 : index
    %c0_137 = arith.constant 0 : index
    %142 = vector.load %arg4[%c5_135, %c0_136, %c0_137] : memref<7x4x128xf32, #tpu.memory_space<vmem>>, vector<1x4x128xf32>
    %143 = vector.shape_cast %142 : vector<1x4x128xf32> to vector<4x128xf32>
    %144 = vector.shape_cast %141 : vector<4x128xf32> to vector<1x4x128xf32>
    tpu.vector_store %arg4[%c5_135, %c0_136, %c0_137], %144 {strides = array<i32>} : memref<7x4x128xf32, #tpu.memory_space<vmem>>, vector<1x4x128xf32>,
    %cst_138 = arith.constant 0.000000e+00 : f32
    %145 = vector.broadcast %cst_138 : f32 to vector<4x128xf32>
    %c0_139 = arith.constant 0 : index
    %c0_140 = arith.constant 0 : index
    %c0_141 = arith.constant 0 : index
    %146 = vector.load %arg2[%c0_139, %c0_140, %c0_141] : memref<3x4x4xbf16, #tpu.memory_space<vmem>>, vector<1x4x4xbf16>
    %147 = vector.shape_cast %146 : vector<1x4x4xbf16> to vector<4x4xbf16>
    %c12_142 = arith.constant 12 : index
    %c0_143 = arith.constant 0 : index
    %c0_144 = arith.constant 0 : index
    %148 = vector.load %arg1[%c12_142, %c0_143, %c0_144] : memref<15x4x128xbf16, #tpu.memory_space<vmem>>, vector<1x4x128xbf16>
    %149 = vector.shape_cast %148 : vector<1x4x128xbf16> to vector<4x128xbf16>
    %cst_145 = arith.constant dense<0.000000e+00> : vector<4x128xf32>
    %150 = tpu.matmul %147, %149, %cst_145 {dimension_numbers = #tpu.dot_dimension_numbers<[1], [0], [0], [1], [0, 0, 1, 1], [], []>} : vector<4x4xbf16>, vector<4x128xbf16>, vector<4x128xf32> -> vector<4x128xf32>
    %151 = arith.addf %145, %150 : vector<4x128xf32>
    %c1_146 = arith.constant 1 : index
    %c0_147 = arith.constant 0 : index
    %c0_148 = arith.constant 0 : index
    %152 = vector.load %arg2[%c1_146, %c0_147, %c0_148] : memref<3x4x4xbf16, #tpu.memory_space<vmem>>, vector<1x4x4xbf16>
    %153 = vector.shape_cast %152 : vector<1x4x4xbf16> to vector<4x4xbf16>
    %c13 = arith.constant 13 : index
    %c0_149 = arith.constant 0 : index
    %c0_150 = arith.constant 0 : index
    %154 = vector.load %arg1[%c13, %c0_149, %c0_150] : memref<15x4x128xbf16, #tpu.memory_space<vmem>>, vector<1x4x128xbf16>
    %155 = vector.shape_cast %154 : vector<1x4x128xbf16> to vector<4x128xbf16>
    %cst_151 = arith.constant dense<0.000000e+00> : vector<4x128xf32>
    %156 = tpu.matmul %153, %155, %cst_151 {dimension_numbers = #tpu.dot_dimension_numbers<[1], [0], [0], [1], [0, 0, 1, 1], [], []>} : vector<4x4xbf16>, vector<4x128xbf16>, vector<4x128xf32> -> vector<4x128xf32>
    %157 = arith.addf %151, %156 : vector<4x128xf32>
    %c2_152 = arith.constant 2 : index
    %c0_153 = arith.constant 0 : index
    %c0_154 = arith.constant 0 : index
    %158 = vector.load %arg2[%c2_152, %c0_153, %c0_154] : memref<3x4x4xbf16, #tpu.memory_space<vmem>>, vector<1x4x4xbf16>
    %159 = vector.shape_cast %158 : vector<1x4x4xbf16> to vector<4x4xbf16>
    %c14 = arith.constant 14 : index
    %c0_155 = arith.constant 0 : index
    %c0_156 = arith.constant 0 : index
    %160 = vector.load %arg1[%c14, %c0_155, %c0_156] : memref<15x4x128xbf16, #tpu.memory_space<vmem>>, vector<1x4x128xbf16>
    %161 = vector.shape_cast %160 : vector<1x4x128xbf16> to vector<4x128xbf16>
    %cst_157 = arith.constant dense<0.000000e+00> : vector<4x128xf32>
    %162 = tpu.matmul %159, %161, %cst_157 {dimension_numbers = #tpu.dot_dimension_numbers<[1], [0], [0], [1], [0, 0, 1, 1], [], []>} : vector<4x4xbf16>, vector<4x128xbf16>, vector<4x128xf32> -> vector<4x128xf32>
    %163 = arith.addf %157, %162 : vector<4x128xf32>
    %164 = vector.broadcast %0 : vector<4x1xf32> to vector<4x128xf32>
    %165 = arith.addf %163, %164 : vector<4x128xf32>
    %c6_158 = arith.constant 6 : index
    %c0_159 = arith.constant 0 : index
    %c0_160 = arith.constant 0 : index
    %166 = vector.load %arg4[%c6_158, %c0_159, %c0_160] : memref<7x4x128xf32, #tpu.memory_space<vmem>>, vector<1x4x128xf32>
    %167 = vector.shape_cast %166 : vector<1x4x128xf32> to vector<4x128xf32>
    %168 = vector.shape_cast %165 : vector<4x128xf32> to vector<1x4x128xf32>
    tpu.vector_store %arg4[%c6_158, %c0_159, %c0_160], %168 {strides = array<i32>} : memref<7x4x128xf32, #tpu.memory_space<vmem>>, vector<1x4x128xf32>,
    return
  }
  func.func @transform_0(%arg0: i32) -> (i32, i32, i32) {
    %c0_i32 = arith.constant 0 : i32
    %c0_i32_0 = arith.constant 0 : i32
    %c0_i32_1 = arith.constant 0 : i32
    return %c0_i32, %c0_i32_0, %arg0 : i32, i32, i32
  }
  func.func @transform_1(%arg0: i32) -> (i32, i32, i32) {
    %c0_i32 = arith.constant 0 : i32
    %c0_i32_0 = arith.constant 0 : i32
    %c0_i32_1 = arith.constant 0 : i32
    %c0_i32_2 = arith.constant 0 : i32
    return %c0_i32, %c0_i32_0, %c0_i32_1 : i32, i32, i32
  }
  func.func @transform_2(%arg0: i32) -> (i32, i32) {
    %c0_i32 = arith.constant 0 : i32
    %c0_i32_0 = arith.constant 0 : i32
    %c0_i32_1 = arith.constant 0 : i32
    return %c0_i32, %c0_i32_0 : i32, i32
  }
  func.func @transform_3(%arg0: i32) -> (i32, i32, i32) {
    %c0_i32 = arith.constant 0 : i32
    %c0_i32_0 = arith.constant 0 : i32
    %c0_i32_1 = arith.constant 0 : i32
    return %c0_i32, %c0_i32_0, %arg0 : i32, i32, i32
  }
}

</mosaic_0001>

<bundles_post_ra>
// kernel: tpu_custom_call.1
= control target key start
LH: loop header
LB: loop body
LE: loop exit
PB: predicated region body
PF: predicated region fallthrough
CT: control target
= control target key end

     0   :  { %8 = vsyncpa [#allocation3], 0  ;;  %s1578_s0 = inlined_call_operand.hbm [shape: bf16[15,4,128], index: 0, kind: input, shape index: {}]   ;;  %s1579_s1 = inlined_call_operand.vmem [shape: bf16[3,4,4], index: 1, kind: input, shape index: {}]   ;;  %s1580_s2 = inlined_call_operand.vmem [shape: f32[4,1], index: 2, kind: input, shape index: {}]   ;;  %s1581_s3 = inlined_call_operand.hbm [shape: f32[7,4,128], index: 3, kind: output, shape index: {}]  }
   0x1   :  { %9 = vsyncpa [#allocation4], 0  ;;  %s1363_s12 = smov [#allocation2]  }
   0x2   :  { %s15_s13 = sshll.u32 %s1363_s12, 4  ;;  %s16_s13 = int_to_ptr.vmem [resolvable:$true] %s15_s13 }
   0x3   :  { %s1327_s14 = scalar_lea.vmem %s16_s13, 480  ;;  %p1332_p1 = scmp.lt.s32.totalorder %s16_s13, %s16_s13 }
   0x4   :  { %p1328_p0 = scmp.ne.s32.totalorder %s16_s13, %s1327_s14  ;;  %p1333_p2 = scmp.lt.s32.totalorder %s1327_s14, %s1327_s14 }
   0x6   :  { %p1334_p3 = por %p1333_p2, %p1332_p1 }
   0x8   :  { %p1335_p4 = pnand %p1334_p3, %p1328_p0 }
   0xa   :  { %1338 = shalt.err (!%p1335_p4)
}
   0xb   :  { %s1364_s15 = smov 32   ;;  %s1365_s16 = smov 2  }
   0xc   :  { %21 = dma.hbm_to_vmem [thread:$0]  %s1578_s0, 480, %s16_s13, [#allocation3], %s1364_s15, %s1364_s15, %s1365_s16  }
   0xd   :  { %1359 = dma.done.wait [#allocation3], 480  }
   0xe   :  { %1360 = vsyncadd [#allocation3], 4294966816  ;;  %v1366_v0 = vmov 0.0   ;;  %vm1367_vm0 = vmmov 0   ;;  %v1368_v1 = vmov 0   ;;  %vm41_vm1 = vcmask 1041408  }
   0xf   :  { %1183 = vmatprep.subr.bf16.mxu0 %v1366_v0  ;;  %1189 = vmatprep.subr.bf16.mxu1 %v1366_v0  ;;  %v36_v2 = vld [vmem:[#allocation2 + $0x2] sm:$0x3]  ;;  %v32_v3 = vld [vmem:[#allocation2] sm:$0x3]  ;;  %vm37_vm2 = vcmask 31744  }
  0x10   :  { %1185 = vmatprep.mubr.msk.bf16.mxu0 %vm1367_vm0, %v1366_v0  ;;  %1191 = vmatprep.mubr.msk.bf16.mxu1 %vm1367_vm0, %v1366_v0  ;;  %v43_v4 = vsel %vm41_vm1, %v36_v2, 0  ;;  %v89_v5 = vsel %vm41_vm1, %v32_v3, 0  ;;  %v134_v6 = vld [vmem:[#allocation2 + $0x4] sm:$0x3]  ;;  %v1106_v7 = vld [vmem:[%s1579_s1 + $0x2] sm:$0x3] }
  0x11   :  { %1318 = vset.pattern.permute.xlu0 %v1368_v1  ;;  %1184 = vmatpush3.bf16.msra.mxu0 %v43_v4  ;;  %v31_v8 = vld [vmem:[%s1579_s1] sm:$0x3]  ;;  %v193_v9 = vld [vmem:[#allocation2 + $0x6] sm:$0x3]  ;;  %v139_v10 = vsel %vm41_vm1, %v134_v6, 0 }
  0x12   :  { %1190 = vmatpush3.bf16.msra.mxu1 %v89_v5  ;;  %1195 = vmatprep.subr.bf16.mxu0 %v1366_v0  ;;  %v198_v11 = vsel %vm41_vm1, %v193_v9, 0  ;;  %v190_v12 = vld [vmem:[#allocation2 + $0x4] sm:$0x3]  ;;  %v288_v13 = vld [vmem:[#allocation2 + $0x8] sm:$0x3] }
  0x13   :  { %1201 = vmatprep.subr.bf16.mxu1 %v1366_v0  ;;  %v1109_v14 = vld [vmem:[%s1579_s1 + $0x4] sm:$0x3]  ;;  %v1111_v15 = vld [vmem:[%s1579_s1 + $0x2] sm:$0x3]  ;;  %v244_v16 = vsel %vm41_vm1, %v190_v12, 0  ;;  %v293_v17 = vsel %vm41_vm1, %v288_v13, 0 }
  0x14   :  { %1186 = vmatmul.mubr.msk.bf16.vlgmr.msra.gmra.mxu0 %vm37_vm2, %v1106_v7  ;;  %v343_v18 = vld [vmem:[#allocation2 + $0xa] sm:$0x3]  ;;  %v340_v19 = vld [vmem:[#allocation2 + $0x8] sm:$0x3]  ;;  %v189_v20 = vld [vmem:[%s1579_s1] sm:$0x3] }
  0x15   :  { %1192 = vmatmul.mubr.msk.bf16.vlgmr.msra.gmra.mxu1 %vm37_vm2, %v31_v8  ;;  %1196 = vmatpush3.bf16.msra.mxu0 %v139_v10  ;;  %v1114_v21 = vld [vmem:[%s1579_s1 + $0x4] sm:$0x3]  ;;  %v348_v22 = vsel %vm41_vm1, %v343_v18, 0  ;;  %v394_v23 = vsel %vm41_vm1, %v340_v19, 0  ;;  %v30_v24 = vld [vmem:[%s1580_s2] sm:$0xf] }
  0x16   :  { %1202 = vmatpush3.bf16.msra.mxu1 %v198_v11  ;;  %1197 = vmatprep.mubr.msk.bf16.mxu0 %vm1367_vm0, %v1366_v0  ;;  %v438_v25 = vld [vmem:[#allocation2 + $0xc] sm:$0x3]  ;;  %v493_v26 = vld [vmem:[#allocation2 + $0xe] sm:$0x3]  ;;  %v1116_v27 = vld [vmem:[%s1579_s1 + $0x2] sm:$0x3] }
  0x17   :  { %1203 = vmatprep.mubr.msk.bf16.mxu1 %vm1367_vm0, %v1366_v0  ;;  %1207 = vmatprep.subr.bf16.mxu0 %v1366_v0  ;;  %v339_v28 = vld [vmem:[%s1579_s1] sm:$0x3]  ;;  %v443_v29 = vsel %vm41_vm1, %v438_v25, 0  ;;  %v498_v30 = vsel %vm41_vm1, %v493_v26, 0  ;;  %v490_v31 = vld [vmem:[#allocation2 + $0xc] sm:$0x3] }
  0x18   :  { %1213 = vmatprep.subr.bf16.mxu1 %v1366_v0  ;;  %184 = vperm.xlu0 %1318, %v30_v24   ;;  %v588_v32 = vld [vmem:[#allocation2 + $0x10] sm:$0x3]  ;;  %v1119_v33 = vld [vmem:[%s1579_s1 + $0x4] sm:$0x3]  ;;  %v1121_v34 = vld [vmem:[%s1579_s1 + $0x2] sm:$0x3] }
  0x19   :  { %v544_v35 = vsel %vm41_vm1, %v490_v31, 0  ;;  %v593_v36 = vsel %vm41_vm1, %v588_v32, 0  ;;  %v643_v37 = vld [vmem:[#allocation2 + $0x12] sm:$0x3]  ;;  %v640_v38 = vld [vmem:[#allocation2 + $0x10] sm:$0x3] }
  0x1a   :  { %v489_v39 = vld [vmem:[%s1579_s1] sm:$0x3]  ;;  %v1124_v40 = vld [vmem:[%s1579_s1 + $0x4] sm:$0x3]  ;;  %v648_v41 = vsel %vm41_vm1, %v643_v37, 0  ;;  %v694_v42 = vsel %vm41_vm1, %v640_v38, 0 }
  0x1b   :  { %v738_v43 = vld [vmem:[#allocation2 + $0x14] sm:$0x3]  ;;  %v793_v44 = vld [vmem:[#allocation2 + $0x16] sm:$0x3]  ;;  %v1126_v45 = vld [vmem:[%s1579_s1 + $0x2] sm:$0x3] }
  0x1c   :  { %1198 = vmatmul.mubr.msk.bf16.vlgmr.msra.gmra.mxu0 %vm37_vm2, %v1109_v14  ;;  %v639_v46 = vld [vmem:[%s1579_s1] sm:$0x3]  ;;  %v743_v47 = vsel %vm41_vm1, %v738_v43, 0  ;;  %v798_v48 = vsel %vm41_vm1, %v793_v44, 0  ;;  %v790_v49 = vld [vmem:[#allocation2 + $0x14] sm:$0x3] }
  0x1d   :  { %1204 = vmatmul.mubr.msk.bf16.vlgmr.msra.gmra.mxu1 %vm37_vm2, %v1111_v15  ;;  %1208 = vmatpush3.bf16.msra.mxu0 %v244_v16  ;;  %v888_v50 = vld [vmem:[#allocation2 + $0x18] sm:$0x3]  ;;  %v1129_v51 = vld [vmem:[%s1579_s1 + $0x4] sm:$0x3]  ;;  %v1131_v52 = vld [vmem:[%s1579_s1 + $0x2] sm:$0x3] }
  0x1e   :  { %1214 = vmatpush3.bf16.msra.mxu1 %v293_v17  ;;  %1209 = vmatprep.mubr.msk.bf16.mxu0 %vm1367_vm0, %v1366_v0  ;;  %v844_v53 = vsel %vm41_vm1, %v790_v49, 0  ;;  %v893_v54 = vsel %vm41_vm1, %v888_v50, 0  ;;  %v943_v55 = vld [vmem:[#allocation2 + $0x1a] sm:$0x3]  ;;  %v940_v56 = vld [vmem:[#allocation2 + $0x18] sm:$0x3] }
  0x1f   :  { %1215 = vmatprep.mubr.msk.bf16.mxu1 %vm1367_vm0, %v1366_v0  ;;  %1219 = vmatprep.subr.bf16.mxu0 %v1366_v0  ;;  %v789_v57 = vld [vmem:[%s1579_s1] sm:$0x3]  ;;  %v1134_v58 = vld [vmem:[%s1579_s1 + $0x4] sm:$0x3]  ;;  %v948_v59 = vsel %vm41_vm1, %v943_v55, 0  ;;  %v994_v60 = vsel %vm41_vm1, %v940_v56, 0 }
  0x20   :  { %1225 = vmatprep.subr.bf16.mxu1 %v1366_v0  ;;  %v1038_v61 = vld [vmem:[#allocation2 + $0x1c] sm:$0x3]  ;;  %v1136_v62 = vld [vmem:[%s1579_s1 + $0x2] sm:$0x3]  ;;  %v939_v63 = vld [vmem:[%s1579_s1] sm:$0x3] }
  0x21   :  { %v1043_v1 = vsel %vm41_vm1, %v1038_v61, 0  ;;  %v1139_v2 = vld [vmem:[%s1579_s1 + $0x4] sm:$0x3]  ;;  %s1369_s1 = smov [#allocation5]  }
  0x22   :  { %s1094_s6 = sshll.u32 %s1369_s1, 4  ;;  %s1095_s6 = int_to_ptr.vmem [resolvable:$true] %s1094_s6 }
  0x23   :  { %s1339_s7 = scalar_lea.vmem %s1095_s6, 448  ;;  %p1344_p6 = scmp.lt.s32.totalorder %s1095_s6, %s1095_s6 }
  0x24   :  { %1210 = vmatmul.mubr.msk.bf16.vlgmr.msra.gmra.mxu0 %vm37_vm2, %v189_v20  ;;  %p1340_p5 = scmp.ne.s32.totalorder %s1095_s6, %s1339_s7  ;;  %p1345_p7 = scmp.lt.s32.totalorder %s1339_s7, %s1339_s7 }
  0x25   :  { %1216 = vmatmul.mubr.msk.bf16.vlgmr.msra.gmra.mxu1 %vm37_vm2, %v1114_v21  ;;  %1220 = vmatpush3.bf16.msra.mxu0 %v348_v22 }
  0x26   :  { %1226 = vmatpush3.bf16.msra.mxu1 %v394_v23  ;;  %1221 = vmatprep.mubr.msk.bf16.mxu0 %vm1367_vm0, %v1366_v0  ;;  %p1346_p8 = por %p1345_p7, %p1344_p6 }
  0x27   :  { %1227 = vmatprep.mubr.msk.bf16.mxu1 %vm1367_vm0, %v1366_v0  ;;  %1231 = vmatprep.subr.bf16.mxu0 %v1366_v0 }
  0x28   :  { %1237 = vmatprep.subr.bf16.mxu1 %v1366_v0  ;;  %p1347_p9 = pnand %p1346_p8, %p1340_p5 }
  0x2c   :  { %1222 = vmatmul.mubr.msk.bf16.vlgmr.msra.gmra.mxu0 %vm37_vm2, %v1116_v27 }
  0x2d   :  { %1228 = vmatmul.mubr.msk.bf16.vlgmr.msra.gmra.mxu1 %vm37_vm2, %v339_v28  ;;  %1232 = vmatpush3.bf16.msra.mxu0 %v443_v29 }
  0x2e   :  { %1238 = vmatpush3.bf16.msra.mxu1 %v498_v30  ;;  %1233 = vmatprep.mubr.msk.bf16.mxu0 %vm1367_vm0, %v1366_v0 }
  0x2f   :  { %1239 = vmatprep.mubr.msk.bf16.mxu1 %vm1367_vm0, %v1366_v0  ;;  %1243 = vmatprep.subr.bf16.mxu0 %v1366_v0 }
  0x30   :  { %1249 = vmatprep.subr.bf16.mxu1 %v1366_v0 }
  0x34   :  { %1234 = vmatmul.mubr.msk.bf16.vlgmr.msra.gmra.mxu0 %vm37_vm2, %v1119_v33 }
  0x35   :  { %1240 = vmatmul.mubr.msk.bf16.vlgmr.msra.gmra.mxu1 %vm37_vm2, %v1121_v34  ;;  %1244 = vmatpush3.bf16.msra.mxu0 %v544_v35 }
  0x36   :  { %1250 = vmatpush3.bf16.msra.mxu1 %v593_v36  ;;  %1245 = vmatprep.mubr.msk.bf16.mxu0 %vm1367_vm0, %v1366_v0 }
  0x37   :  { %1251 = vmatprep.mubr.msk.bf16.mxu1 %vm1367_vm0, %v1366_v0  ;;  %1255 = vmatprep.subr.bf16.mxu0 %v1366_v0 }
  0x38   :  { %1261 = vmatprep.subr.bf16.mxu1 %v1366_v0 }
  0x3c   :  { %1246 = vmatmul.mubr.msk.bf16.vlgmr.msra.gmra.mxu0 %vm37_vm2, %v489_v39 }
  0x3d   :  { %1252 = vmatmul.mubr.msk.bf16.vlgmr.msra.gmra.mxu1 %vm37_vm2, %v1124_v40  ;;  %1256 = vmatpush3.bf16.msra.mxu0 %v648_v41 }
  0x3e   :  { %1262 = vmatpush3.bf16.msra.mxu1 %v694_v42  ;;  %1257 = vmatprep.mubr.msk.bf16.mxu0 %vm1367_vm0, %v1366_v0 }
  0x3f   :  { %1263 = vmatprep.mubr.msk.bf16.mxu1 %vm1367_vm0, %v1366_v0  ;;  %1267 = vmatprep.subr.bf16.mxu0 %v1366_v0 }
  0x40   :  { %1273 = vmatprep.subr.bf16.mxu1 %v1366_v0 }
  0x44   :  { %1258 = vmatmul.mubr.msk.bf16.vlgmr.msra.gmra.mxu0 %vm37_vm2, %v1126_v45 }
  0x45   :  { %1264 = vmatmul.mubr.msk.bf16.vlgmr.msra.gmra.mxu1 %vm37_vm2, %v639_v46  ;;  %1268 = vmatpush3.bf16.msra.mxu0 %v743_v47 }
  0x46   :  { %1274 = vmatpush3.bf16.msra.mxu1 %v798_v48  ;;  %1269 = vmatprep.mubr.msk.bf16.mxu0 %vm1367_vm0, %v1366_v0 }
  0x47   :  { %1275 = vmatprep.mubr.msk.bf16.mxu1 %vm1367_vm0, %v1366_v0  ;;  %1279 = vmatprep.subr.bf16.mxu0 %v1366_v0 }
  0x48   :  { %1285 = vmatprep.subr.bf16.mxu1 %v1366_v0 }
  0x4c   :  { %1270 = vmatmul.mubr.msk.bf16.vlgmr.msra.gmra.mxu0 %vm37_vm2, %v1129_v51 }
  0x4d   :  { %1276 = vmatmul.mubr.msk.bf16.vlgmr.msra.gmra.mxu1 %vm37_vm2, %v1131_v52  ;;  %1280 = vmatpush3.bf16.msra.mxu0 %v844_v53 }
  0x4e   :  { %1286 = vmatpush3.bf16.msra.mxu1 %v893_v54  ;;  %1281 = vmatprep.mubr.msk.bf16.mxu0 %vm1367_vm0, %v1366_v0 }
  0x4f   :  { %1287 = vmatprep.mubr.msk.bf16.mxu1 %vm1367_vm0, %v1366_v0  ;;  %1291 = vmatprep.subr.bf16.mxu0 %v1366_v0 }
  0x50   :  { %1297 = vmatprep.subr.bf16.mxu1 %v1366_v0 }
  0x54   :  { %1282 = vmatmul.mubr.msk.bf16.vlgmr.msra.gmra.mxu0 %vm37_vm2, %v789_v57 }
  0x55   :  { %1288 = vmatmul.mubr.msk.bf16.vlgmr.msra.gmra.mxu1 %vm37_vm2, %v1134_v58  ;;  %1292 = vmatpush3.bf16.msra.mxu0 %v948_v59 }
  0x56   :  { %1298 = vmatpush3.bf16.msra.mxu1 %v994_v60  ;;  %1293 = vmatprep.mubr.msk.bf16.mxu0 %vm1367_vm0, %v1366_v0 }
  0x57   :  { %1299 = vmatprep.mubr.msk.bf16.mxu1 %vm1367_vm0, %v1366_v0  ;;  %1303 = vmatprep.subr.bf16.mxu0 %v1366_v0 }
  0x5c   :  { %1294 = vmatmul.mubr.msk.bf16.vlgmr.msra.gmra.mxu0 %vm37_vm2, %v1136_v62 }
  0x5d   :  { %1300 = vmatmul.mubr.msk.bf16.vlgmr.msra.gmra.mxu1 %vm37_vm2, %v939_v63  ;;  %1304 = vmatpush3.bf16.msra.mxu0 %v1043_v1 }
  0x5e   :  { %1305 = vmatprep.mubr.msk.bf16.mxu0 %vm1367_vm0, %v1366_v0 }
  0x64   :  { %1306 = vmatmul.mubr.msk.bf16.vlgmr.msra.gmra.mxu0 %vm37_vm2, %v1139_v2 }
  0x93   :  { %v1566_v12 = vpop.permute.xlu0 %184 }
  0xd4   :  { %v79_v3 = vpop.f32.mrf.mxu0 }
  0xd5   :  { %v125_v4 = vpop.f32.mrf.mxu1 }
  0xd6   :  { %v1187_v5 = vpop.f32.mrf.mxu0  ;;  %v126_v11 = vadd.f32 %v125_v4, %v79_v3 }
  0xd7   :  { %v1193_v6 = vpop.f32.mrf.mxu1 }
  0xd8   :  { %v82_v7 = vpop.f32.mrf.mxu0 }
  0xd9   :  { %v128_v8 = vpop.f32.mrf.mxu1 }
  0xda   :  { %v1188_v9 = vpop.f32.mrf.mxu0 }
  0xdb   :  { %v1194_v10 = vpop.f32.mrf.mxu1 }
  0xdc   :  { %v175_v13 = vpop.f32.mrf.mxu0 }
  0xdd   :  { %v234_v14 = vpop.f32.mrf.mxu1  ;;  %v181_v0 = vadd.f32 %v175_v13, %v126_v11 }
  0xde   :  { %v1199_v15 = vpop.f32.mrf.mxu0 }
  0xdf   :  { %v1205_v16 = vpop.f32.mrf.mxu1  ;;  %v187_v17 = vadd.f32 %v1566_v12, %v181_v0 }
  0xe0   :  { %v178_v18 = vpop.f32.mrf.mxu0 }
  0xe1   :  { %v237_v19 = vpop.f32.mrf.mxu1  ;;  %188 = vst [vmem:[#allocation5] sm:$0xf] %v187_v17 }
  0xe2   :  { %v1200_v20 = vpop.f32.mrf.mxu0 }
  0xe3   :  { %v1206_v21 = vpop.f32.mrf.mxu1 }
  0xe4   :  { %v280_v22 = vpop.f32.mrf.mxu0 }
  0xe5   :  { %v329_v23 = vpop.f32.mrf.mxu1  ;;  %v281_v24 = vadd.f32 %v280_v22, %v234_v14 }
  0xe6   :  { %v1211_v25 = vpop.f32.mrf.mxu0 }
  0xe7   :  { %v1217_v26 = vpop.f32.mrf.mxu1  ;;  %v335_v27 = vadd.f32 %v329_v23, %v281_v24 }
  0xe8   :  { %v283_v28 = vpop.f32.mrf.mxu0 }
  0xe9   :  { %v332_v29 = vpop.f32.mrf.mxu1  ;;  %v336_v30 = vadd.f32 %v335_v27, %v1566_v12 }
  0xea   :  { %v1212_v31 = vpop.f32.mrf.mxu0 }
  0xeb   :  { %v1218_v32 = vpop.f32.mrf.mxu1  ;;  %338 = vst [vmem:[#allocation5 + $0x4] sm:$0xf] %v336_v30 }
  0xec   :  { %v384_v33 = vpop.f32.mrf.mxu0 }
  0xed   :  { %v430_v34 = vpop.f32.mrf.mxu1 }
  0xee   :  { %v1223_v35 = vpop.f32.mrf.mxu0  ;;  %v431_v41 = vadd.f32 %v430_v34, %v384_v33 }
  0xef   :  { %v1229_v36 = vpop.f32.mrf.mxu1 }
  0xf0   :  { %v387_v37 = vpop.f32.mrf.mxu0 }
  0xf1   :  { %v433_v38 = vpop.f32.mrf.mxu1 }
  0xf2   :  { %v1224_v39 = vpop.f32.mrf.mxu0 }
  0xf3   :  { %v1230_v40 = vpop.f32.mrf.mxu1 }
  0xf4   :  { %v479_v42 = vpop.f32.mrf.mxu0 }
  0xf5   :  { %v534_v43 = vpop.f32.mrf.mxu1  ;;  %v485_v44 = vadd.f32 %v479_v42, %v431_v41 }
  0xf6   :  { %v1235_v45 = vpop.f32.mrf.mxu0 }
  0xf7   :  { %v1241_v46 = vpop.f32.mrf.mxu1  ;;  %v486_v47 = vadd.f32 %v485_v44, %v1566_v12 }
  0xf8   :  { %v482_v48 = vpop.f32.mrf.mxu0 }
  0xf9   :  { %v537_v49 = vpop.f32.mrf.mxu1  ;;  %488 = vst [vmem:[#allocation5 + $0x8] sm:$0xf] %v486_v47 }
  0xfa   :  { %v1236_v50 = vpop.f32.mrf.mxu0 }
  0xfb   :  { %v1242_v51 = vpop.f32.mrf.mxu1 }
  0xfc   :  { %v580_v52 = vpop.f32.mrf.mxu0 }
  0xfd   :  { %v629_v53 = vpop.f32.mrf.mxu1  ;;  %v581_v54 = vadd.f32 %v580_v52, %v534_v43 }
  0xfe   :  { %v1247_v55 = vpop.f32.mrf.mxu0 }
  0xff   :  { %v1253_v56 = vpop.f32.mrf.mxu1  ;;  %v635_v57 = vadd.f32 %v629_v53, %v581_v54 }
 0x100   :  { %v583_v58 = vpop.f32.mrf.mxu0 }
 0x101   :  { %v632_v59 = vpop.f32.mrf.mxu1  ;;  %v636_v60 = vadd.f32 %v635_v57, %v1566_v12 }
 0x102   :  { %v1248_v61 = vpop.f32.mrf.mxu0 }
 0x103   :  { %v1254_v62 = vpop.f32.mrf.mxu1  ;;  %638 = vst [vmem:[#allocation5 + $0xc] sm:$0xf] %v636_v60 }
 0x104   :  { %v684_v63 = vpop.f32.mrf.mxu0 }
 0x105   :  { %v730_v1 = vpop.f32.mrf.mxu1 }
 0x106   :  { %v1259_v2 = vpop.f32.mrf.mxu0  ;;  %v731_v8 = vadd.f32 %v730_v1, %v684_v63 }
 0x107   :  { %v1265_v3 = vpop.f32.mrf.mxu1 }
 0x108   :  { %v687_v4 = vpop.f32.mrf.mxu0 }
 0x109   :  { %v733_v5 = vpop.f32.mrf.mxu1 }
 0x10a   :  { %v1260_v6 = vpop.f32.mrf.mxu0 }
 0x10b   :  { %v1266_v7 = vpop.f32.mrf.mxu1 }
 0x10c   :  { %v779_v9 = vpop.f32.mrf.mxu0 }
 0x10d   :  { %v834_v10 = vpop.f32.mrf.mxu1  ;;  %v785_v11 = vadd.f32 %v779_v9, %v731_v8 }
 0x10e   :  { %v1271_v13 = vpop.f32.mrf.mxu0 }
 0x10f   :  { %v1277_v14 = vpop.f32.mrf.mxu1  ;;  %v786_v0 = vadd.f32 %v785_v11, %v1566_v12 }
 0x110   :  { %v782_v15 = vpop.f32.mrf.mxu0 }
 0x111   :  { %v837_v16 = vpop.f32.mrf.mxu1  ;;  %788 = vst [vmem:[#allocation5 + $0x10] sm:$0xf] %v786_v0 }
 0x112   :  { %v1272_v17 = vpop.f32.mrf.mxu0 }
 0x113   :  { %v1278_v18 = vpop.f32.mrf.mxu1 }
 0x114   :  { %v880_v19 = vpop.f32.mrf.mxu0 }
 0x115   :  { %v929_v20 = vpop.f32.mrf.mxu1  ;;  %v881_v21 = vadd.f32 %v880_v19, %v834_v10 }
 0x116   :  { %v1283_v22 = vpop.f32.mrf.mxu0 }
 0x117   :  { %v1289_v23 = vpop.f32.mrf.mxu1  ;;  %v935_v24 = vadd.f32 %v929_v20, %v881_v21 }
 0x118   :  { %v883_v25 = vpop.f32.mrf.mxu0 }
 0x119   :  { %v932_v26 = vpop.f32.mrf.mxu1  ;;  %v936_v27 = vadd.f32 %v935_v24, %v1566_v12 }
 0x11a   :  { %v1284_v28 = vpop.f32.mrf.mxu0 }
 0x11b   :  { %v1290_v29 = vpop.f32.mrf.mxu1  ;;  %938 = vst [vmem:[#allocation5 + $0x14] sm:$0xf] %v936_v27 }
 0x11c   :  { %v984_v30 = vpop.f32.mrf.mxu0 }
 0x11d   :  { %v1030_v31 = vpop.f32.mrf.mxu1 }
 0x11e   :  { %v1295_v32 = vpop.f32.mrf.mxu0  ;;  %v1031_v38 = vadd.f32 %v1030_v31, %v984_v30 }
 0x11f   :  { %v1301_v33 = vpop.f32.mrf.mxu1 }
 0x120   :  { %v987_v34 = vpop.f32.mrf.mxu0 }
 0x121   :  { %v1033_v35 = vpop.f32.mrf.mxu1 }
 0x122   :  { %v1296_v36 = vpop.f32.mrf.mxu0 }
 0x123   :  { %v1302_v37 = vpop.f32.mrf.mxu1 }
 0x124   :  { %v1079_v39 = vpop.f32.mrf.mxu0 }
 0x125   :  { %v1085_v40 = vadd.f32 %v1079_v39, %v1031_v38 }
 0x126   :  { %v1307_v41 = vpop.f32.mrf.mxu0 }
 0x127   :  { %v1086_v42 = vadd.f32 %v1085_v40, %v1566_v12 }
 0x128   :  { %v1082_v43 = vpop.f32.mrf.mxu0 }
 0x129   :  { %1088 = vst [vmem:[#allocation5 + $0x18] sm:$0xf] %v1086_v42 }
 0x12a   :  { %v1308_v44 = vpop.f32.mrf.mxu0 }
 0x12b   :  { %1350 = shalt.err (!%p1347_p9)
}
 0x12c   :  { %s1370_s8 = smov 64   ;;  %s1371_s2 = smov 4  }
 0x12d   :  { %1100 = dma.vmem_to_hbm [thread:$0]  %s1095_s6, 448, %s1581_s3, [#allocation4], %s1370_s8, %s1370_s8, %s1371_s2  }
 0x12e   :  { %1361 = dma.done.wait [#allocation4], 448  }
 0x12f   :  { %1362 = vsyncadd [#allocation4], 4294966848 }
 0x130   :  { %1104 = vsyncpa [#allocation3], 1 }
 0x131   :  { %1105 = vsyncpa [#allocation4], 1 }

</bundles_post_ra>
